<compile_context>
chip_gen: v7x
topology: tpu7x:2x2x1
jax: 0.10.0
libtpu: 0.0.40
codegen_flags: <defaults>
</compile_context>

<pallas_src>
import numpy as np
import jax
import jax.numpy as jnp
from jax.experimental import pallas as pl
from jax.experimental.pallas import tpu as pltpu


def _scalar_kernel(c_ref, o_ref):
    # Single scalar copy through SMEM: one sld + one sst. No vector pipeline,
    # no VMEM tile padding, no vector DMA.
    o_ref[0] = c_ref[0]


def scalar_forward_pallas(constant_1d):
    """Framework-parity Pallas path: forward the (1,) f32 parameter via SMEM."""
    return pl.pallas_call(
        _scalar_kernel,
        out_shape=jax.ShapeDtypeStruct((1,), jnp.float32),
        in_specs=[pl.BlockSpec(memory_space=pltpu.SMEM)],
        out_specs=pl.BlockSpec(memory_space=pltpu.SMEM),
        input_output_aliases={0: 0},  # output reuses the input buffer
    )(constant_1d)


def scalar_forward(constant_1d, *, use_pallas=True):
    """Pallas equivalent of Scalar.forward(): return the scalar parameter.

    use_pallas=False is the recommended production path (zero-overhead buffer
    forward; XLA fuses the identity into the consumer).
    """
    if use_pallas:
        out = scalar_forward_pallas(constant_1d)
    else:
        out = constant_1d
    return out[0]  # 0-d f32, matching `return self.constant`


class Scalar:
    """JAX mirror of the PyTorch Scalar module."""

    def __init__(self, init_value):
        # Stored persistently as shape (1,) so no per-call reshape ops are
        # emitted around the kernel.
        self.constant = jnp.full((1,), init_value, dtype=jnp.float32)

    def __call__(self, *, use_pallas=True):
        return scalar_forward(self.constant, use_pallas=use_pallas)


if __name__ == "__main__":
    key = jax.random.PRNGKey(0)
    # Deterministic init_value the module would be constructed with.
    init_value = float(jax.random.normal(key, (), dtype=jnp.float32))

    module = Scalar(init_value)

    # Pallas (framework-parity) path.
    out = jax.block_until_ready(module(use_pallas=True))
    # Recommended zero-overhead path.
    out_fast = jax.block_until_ready(module(use_pallas=False))

    # Reference semantics: forward() returns the parameter itself, unchanged.
    np.testing.assert_allclose(np.asarray(out), np.float32(init_value),
                               rtol=0.0, atol=0.0)
    np.testing.assert_allclose(np.asarray(out_fast), np.float32(init_value),
                               rtol=0.0, atol=0.0)
    assert out.shape == ()
    assert out.dtype == jnp.float32

    print("KERNEL_OK")
</pallas_src>

<mosaic_0001>
module attributes {stable_mosaic.version = 11 : i64} {
  func.func @_scalar_kernel(%arg0: memref<1xf32, #tpu.memory_space<smem>>, %arg1: memref<1xf32, #tpu.memory_space<smem>>) attributes {dimension_semantics = [], scalar_prefetch = 0 : i64, scratch_operands = 0 : i64, tpu.core_type = #tpu.core_type<tc>} {
    %c0 = arith.constant 0 : index
    %0 = memref.load %arg0[%c0] : memref<1xf32, #tpu.memory_space<smem>>
    %c0_0 = arith.constant 0 : index
    %1 = memref.load %arg1[%c0_0] : memref<1xf32, #tpu.memory_space<smem>>
    memref.store %0, %arg1[%c0_0] : memref<1xf32, #tpu.memory_space<smem>>
    return
  }
}

</mosaic_0001>

<bundles_post_ra>
// kernel: tpu_custom_call.1
= control target key start
LH: loop header
LB: loop body
LE: loop exit
PB: predicated region body
PF: predicated region fallthrough
CT: control target
= control target key end

     0   :  { %7 = vsyncpa [#allocation4], 0  ;;  %s65_s0 = inlined_call_operand.<no memory space> [shape: f32[1], index: 0, kind: input, shape index: {}, may-alias: {0,1}]   ;;  %s66_s1 = inlined_call_operand.hbm [shape: f32[1], index: 1, kind: output, shape index: {}, may-alias: {0,1}]  }
   0x1   :  { %12 = sst [smem:[#allocation3]] %s65_s0  ;;  %s27_s10 = scalar_lea.hbm %s66_s1, 16 }
   0x2   :  { %p28_p0 = scmp.ne.s32.totalorder %s66_s1, %s27_s10  ;;  %p31_p1 = scmp.lt.u32.totalorder %s27_s10, %s66_s1 }
   0x4   :  { %p33_p2 = pnand %p31_p1, %p28_p0 }
   0x6   :  { %36 = shalt.err (!%p33_p2)
}
   0x7   :  { %s39_s15 = smov [#allocation3]  }
   0x8   :  { %20 = dma.smem_to_hbm %s39_s15, 16, %s66_s1, [#allocation4]  }
   0x9   :  { %37 = dma.done.wait [#allocation4], 16  }
   0xa   :  { %38 = vsyncadd [#allocation4], 4294967280 }
   0xb   :  { %24 = sfence }
   0xc   :  { %25 = vsyncpa [#allocation4], 1 }

</bundles_post_ra>
